<compile_context>
chip_gen: v5e
topology: v5e:2x2
jax: 0.10.0
libtpu: 0.0.40
codegen_flags: <defaults>
</compile_context>

<pallas_src>
import jax
import jax.numpy as jnp
import numpy as np
from jax import lax
from jax.experimental import pallas as pl
from jax.experimental.pallas import tpu as pltpu


def _encoder_gru_kernel(tok_ref,                       # SMEM (T*B,) int32, time-major
                        h0_ref,                        # VMEM (2, B, H)
                        emb_ref,                       # VMEM (V, H)
                        wih_f_ref, whh_f_ref, bih_f_ref, bhh_f_ref,   # fwd dir
                        wih_b_ref, whh_b_ref, bih_b_ref, bhh_b_ref,   # bwd dir
                        out_f_ref, out_b_ref, hn_ref,  # outputs
                        emb_s_ref, gi_f_ref, gi_b_ref):  # VMEM scratch
    f32 = jnp.float32
    T, B, H = out_f_ref.shape
    N = T * B

    # ---- embedding gather: one dynamic-slice row copy per (t, b) token ------
    def gather_body(i, carry):
        tok = tok_ref[i]                                   # scalar read from SMEM
        emb_s_ref[pl.ds(i, 1), :] = emb_ref[pl.ds(tok, 1), :]
        return carry

    lax.fori_loop(0, N, gather_body, jnp.int32(0))

    # ---- fused input-to-hidden projection for the whole sequence ------------
    x = emb_s_ref[...]                                     # (T*B, H)
    gi_f_ref[...] = (jnp.dot(x, wih_f_ref[...], preferred_element_type=f32)
                     + bih_f_ref[...])                     # (T*B, 3H)
    gi_b_ref[...] = (jnp.dot(x, wih_b_ref[...], preferred_element_type=f32)
                     + bih_b_ref[...])                     # (T*B, 3H)

    whh_f = whh_f_ref[...]
    bhh_f = bhh_f_ref[...]
    whh_b = whh_b_ref[...]
    bhh_b = bhh_b_ref[...]

    # PyTorch GRU cell, gate order (r, z, n), fused (B,H)x(H,3H) hidden matmul.
    def gru_step(gi, h, whh, bhh):
        gh = jnp.dot(h, whh, preferred_element_type=f32) + bhh      # (B, 3H)
        r = jax.nn.sigmoid(gi[:, 0 * H:1 * H] + gh[:, 0 * H:1 * H])
        z = jax.nn.sigmoid(gi[:, 1 * H:2 * H] + gh[:, 1 * H:2 * H])
        n = jnp.tanh(gi[:, 2 * H:3 * H] + r * gh[:, 2 * H:3 * H])
        return (1.0 - z) * n + z * h

    # ---- forward direction ---------------------------------------------------
    def fwd_body(t, h):
        gi = gi_f_ref[pl.ds(t * B, B), :]                  # (B, 3H) at time t
        h_new = gru_step(gi, h, whh_f, bhh_f)
        out_f_ref[t] = h_new                               # time-major store
        return h_new

    h_f = lax.fori_loop(0, T, fwd_body, h0_ref[0])

    # ---- backward direction (reversed time) ----------------------------------
    def bwd_body(i, h):
        t = T - 1 - i
        gi = gi_b_ref[pl.ds(t * B, B), :]
        h_new = gru_step(gi, h, whh_b, bhh_b)
        out_b_ref[t] = h_new
        return h_new

    h_b = lax.fori_loop(0, T, bwd_body, h0_ref[1])

    hn_ref[0] = h_f
    hn_ref[1] = h_b


def prepare_params(raw):
    """Hoisted weight prep: call ONCE, reuse across every encoder call."""
    f32 = jnp.float32

    def tr(w):
        return jnp.asarray(w, f32).T                       # (3H, H) -> (H, 3H)

    def row(b):
        return jnp.asarray(b, f32)[None, :]                # (3H,) -> (1, 3H)

    return {
        "embedding": jnp.asarray(raw["embedding"], f32),
        "wih_f": tr(raw["W_ih_l0"]), "whh_f": tr(raw["W_hh_l0"]),
        "bih_f": row(raw["b_ih_l0"]), "bhh_f": row(raw["b_hh_l0"]),
        "wih_b": tr(raw["W_ih_l0_rev"]), "whh_b": tr(raw["W_hh_l0_rev"]),
        "bih_b": row(raw["b_ih_l0_rev"]), "bhh_b": row(raw["b_hh_l0_rev"]),
    }


@jax.jit
def encoder_forward(prepped, tokens, hidden):
    """tokens: (B, T) int32, hidden: (2, B, H) f32 -> (output (B,T,2H), h_n (2,B,H))."""
    B, T = tokens.shape
    H = hidden.shape[-1]

    # time-major flattened token ids: index i = t*B + b
    tok_tm = jnp.swapaxes(tokens.astype(jnp.int32), 0, 1).reshape(T * B)

    vmem = pl.BlockSpec(memory_space=pltpu.MemorySpace.VMEM)
    smem = pl.BlockSpec(memory_space=pltpu.MemorySpace.SMEM)

    out_shape = (
        jax.ShapeDtypeStruct((T, B, H), jnp.float32),      # forward hiddens, time-major
        jax.ShapeDtypeStruct((T, B, H), jnp.float32),      # backward hiddens, time-major
        jax.ShapeDtypeStruct((2, B, H), jnp.float32),      # final hidden states
    )

    out_f, out_b, h_n = pl.pallas_call(
        _encoder_gru_kernel,
        out_shape=out_shape,
        in_specs=[smem] + [vmem] * 10,
        out_specs=(vmem, vmem, vmem),
        scratch_shapes=[
            pltpu.VMEM((T * B, H), jnp.float32),           # gathered embeddings
            pltpu.VMEM((T * B, 3 * H), jnp.float32),       # fwd input-gate pre-acts
            pltpu.VMEM((T * B, 3 * H), jnp.float32),       # bwd input-gate pre-acts
        ],
    )(tok_tm, hidden, prepped["embedding"],
      prepped["wih_f"], prepped["whh_f"], prepped["bih_f"], prepped["bhh_f"],
      prepped["wih_b"], prepped["whh_b"], prepped["bih_b"], prepped["bhh_b"])

    # glue: back to batch_first, concat directions (matches PyTorch GRU output)
    output = jnp.concatenate(
        [jnp.swapaxes(out_f, 0, 1), jnp.swapaxes(out_b, 0, 1)], axis=-1)
    return output, h_n


# ---------------- plain-JAX reference (for the sanity check) -----------------
def ref_forward(params, tokens, h0):
    H = h0.shape[-1]
    T = tokens.shape[1]
    emb = params["embedding"][tokens]                      # (B, T, H)

    def step(x, h, Wih, Whh, bih, bhh):
        gi = x @ Wih.T + bih
        gh = h @ Whh.T + bhh
        r = jax.nn.sigmoid(gi[:, :H] + gh[:, :H])
        z = jax.nn.sigmoid(gi[:, H:2 * H] + gh[:, H:2 * H])
        n = jnp.tanh(gi[:, 2 * H:] + r * gh[:, 2 * H:])
        return (1.0 - z) * n + z * h

    h_f = h0[0]
    outs_f = []
    for t in range(T):
        h_f = step(emb[:, t], h_f, params["W_ih_l0"], params["W_hh_l0"],
                   params["b_ih_l0"], params["b_hh_l0"])
        outs_f.append(h_f)

    h_b = h0[1]
    outs_b = [None] * T
    for t in range(T - 1, -1, -1):
        h_b = step(emb[:, t], h_b, params["W_ih_l0_rev"], params["W_hh_l0_rev"],
                   params["b_ih_l0_rev"], params["b_hh_l0_rev"])
        outs_b[t] = h_b

    output = jnp.concatenate([jnp.stack(outs_f, 1), jnp.stack(outs_b, 1)], axis=-1)
    h_n = jnp.stack([h_f, h_b], axis=0)
    return output, h_n


def init_params(key, V, H):
    ks = jax.random.split(key, 9)
    s = 0.1
    emb = jax.random.normal(ks[0], (V, H), jnp.float32) * s
    emb = emb.at[0].set(0.0)        # padding_idx=0 row zeroed, as nn.Embedding does at init
    return {
        "embedding":     emb,
        "W_ih_l0":       jax.random.normal(ks[1], (3 * H, H), jnp.float32) * s,
        "W_hh_l0":       jax.random.normal(ks[2], (3 * H, H), jnp.float32) * s,
        "b_ih_l0":       jax.random.normal(ks[3], (3 * H,), jnp.float32) * s,
        "b_hh_l0":       jax.random.normal(ks[4], (3 * H,), jnp.float32) * s,
        "W_ih_l0_rev":   jax.random.normal(ks[5], (3 * H, H), jnp.float32) * s,
        "W_hh_l0_rev":   jax.random.normal(ks[6], (3 * H, H), jnp.float32) * s,
        "b_ih_l0_rev":   jax.random.normal(ks[7], (3 * H,), jnp.float32) * s,
        "b_hh_l0_rev":   jax.random.normal(ks[8], (3 * H,), jnp.float32) * s,
    }


if __name__ == "__main__":
    B, T, H, V = 2, 8, 32, 50

    key = jax.random.PRNGKey(0)
    kp, k1, k2 = jax.random.split(key, 3)
    params = init_params(kp, V, H)

    tokens = jax.random.randint(k1, (B, T), 0, V, dtype=jnp.int32)
    # EncoderRNN.init_hidden gives zeros; use a small random hidden to also
    # exercise the h0 path (forward accepts arbitrary hidden).
    hidden = jax.random.normal(k2, (2, B, H), jnp.float32) * 0.1

    prepped = prepare_params(params)                       # hoisted, once
    output, h_n = encoder_forward(prepped, tokens, hidden)
    output, h_n = jax.block_until_ready((output, h_n))

    # sanity check against a plain-JAX reference
    ref_out, ref_hn = ref_forward(params, tokens, hidden)
    np.testing.assert_allclose(np.asarray(output), np.asarray(ref_out),
                               rtol=2e-3, atol=2e-4)
    np.testing.assert_allclose(np.asarray(h_n), np.asarray(ref_hn),
                               rtol=2e-3, atol=2e-4)

    print("KERNEL_OK")
</pallas_src>

<mosaic_0001>
module attributes {stable_mosaic.version = 11 : i64} {
  func.func @_encoder_gru_kernel(%arg0: memref<16xi32, #tpu.memory_space<smem>>, %arg1: memref<2x2x32xf32, #tpu.memory_space<vmem>>, %arg2: memref<50x32xf32, #tpu.memory_space<vmem>>, %arg3: memref<32x96xf32, #tpu.memory_space<vmem>>, %arg4: memref<32x96xf32, #tpu.memory_space<vmem>>, %arg5: memref<1x96xf32, #tpu.memory_space<vmem>>, %arg6: memref<1x96xf32, #tpu.memory_space<vmem>>, %arg7: memref<32x96xf32, #tpu.memory_space<vmem>>, %arg8: memref<32x96xf32, #tpu.memory_space<vmem>>, %arg9: memref<1x96xf32, #tpu.memory_space<vmem>>, %arg10: memref<1x96xf32, #tpu.memory_space<vmem>>, %arg11: memref<8x2x32xf32, #tpu.memory_space<vmem>>, %arg12: memref<8x2x32xf32, #tpu.memory_space<vmem>>, %arg13: memref<2x2x32xf32, #tpu.memory_space<vmem>>, %arg14: memref<16x32xf32, #tpu.memory_space<vmem>>, %arg15: memref<16x96xf32, #tpu.memory_space<vmem>>, %arg16: memref<16x96xf32, #tpu.memory_space<vmem>>) attributes {dimension_semantics = [], scalar_prefetch = 0 : i64, scratch_operands = 3 : i64, tpu.core_type = #tpu.core_type<tc>} {
    %c0_i32 = arith.constant 0 : i32
    %c16_i32 = arith.constant 16 : i32
    %0 = arith.addi %c0_i32, %c16_i32 : i32
    %c1_i32 = arith.constant 1 : i32
    scf.for %arg17 = %c0_i32 to %0 step %c1_i32  : i32 {
      %32 = arith.index_cast %arg17 : i32 to index
      %33 = memref.load %arg0[%32] : memref<16xi32, #tpu.memory_space<smem>>
      %34 = arith.index_cast %33 : i32 to index
      %c0_41 = arith.constant 0 : index
      %35 = vector.load %arg2[%34, %c0_41] : memref<50x32xf32, #tpu.memory_space<vmem>>, vector<1x32xf32>
      %36 = arith.index_cast %arg17 : i32 to index
      %c0_42 = arith.constant 0 : index
      %37 = vector.load %arg14[%36, %c0_42] : memref<16x32xf32, #tpu.memory_space<vmem>>, vector<1x32xf32>
      tpu.vector_store %arg14[%36, %c0_42], %35 {strides = array<i32>} : memref<16x32xf32, #tpu.memory_space<vmem>>, vector<1x32xf32>,
    }
    %c16_i32_0 = arith.constant 16 : i32
    %c0 = arith.constant 0 : index
    %c0_1 = arith.constant 0 : index
    %1 = vector.load %arg14[%c0, %c0_1] : memref<16x32xf32, #tpu.memory_space<vmem>>, vector<16x32xf32>
    %c0_2 = arith.constant 0 : index
    %c0_3 = arith.constant 0 : index
    %2 = vector.load %arg3[%c0_2, %c0_3] : memref<32x96xf32, #tpu.memory_space<vmem>>, vector<32x96xf32>
    %cst = arith.constant dense<0.000000e+00> : vector<16x96xf32>
    %3 = tpu.matmul %1, %2, %cst {dimension_numbers = #tpu.dot_dimension_numbers<[1], [0], [0], [1], [0, 0, 1, 1], [], []>} : vector<16x32xf32>, vector<32x96xf32>, vector<16x96xf32> -> vector<16x96xf32>
    %c0_4 = arith.constant 0 : index
    %c0_5 = arith.constant 0 : index
    %4 = vector.load %arg5[%c0_4, %c0_5] : memref<1x96xf32, #tpu.memory_space<vmem>>, vector<1x96xf32>
    %5 = vector.broadcast %4 : vector<1x96xf32> to vector<16x96xf32>
    %6 = arith.addf %3, %5 : vector<16x96xf32>
    %c0_6 = arith.constant 0 : index
    %c0_7 = arith.constant 0 : index
    %7 = vector.load %arg15[%c0_6, %c0_7] : memref<16x96xf32, #tpu.memory_space<vmem>>, vector<16x96xf32>
    tpu.vector_store %arg15[%c0_6, %c0_7], %6 {strides = array<i32>} : memref<16x96xf32, #tpu.memory_space<vmem>>, vector<16x96xf32>,
    %c0_8 = arith.constant 0 : index
    %c0_9 = arith.constant 0 : index
    %8 = vector.load %arg7[%c0_8, %c0_9] : memref<32x96xf32, #tpu.memory_space<vmem>>, vector<32x96xf32>
    %cst_10 = arith.constant dense<0.000000e+00> : vector<16x96xf32>
    %9 = tpu.matmul %1, %8, %cst_10 {dimension_numbers = #tpu.dot_dimension_numbers<[1], [0], [0], [1], [0, 0, 1, 1], [], []>} : vector<16x32xf32>, vector<32x96xf32>, vector<16x96xf32> -> vector<16x96xf32>
    %c0_11 = arith.constant 0 : index
    %c0_12 = arith.constant 0 : index
    %10 = vector.load %arg9[%c0_11, %c0_12] : memref<1x96xf32, #tpu.memory_space<vmem>>, vector<1x96xf32>
    %11 = vector.broadcast %10 : vector<1x96xf32> to vector<16x96xf32>
    %12 = arith.addf %9, %11 : vector<16x96xf32>
    %c0_13 = arith.constant 0 : index
    %c0_14 = arith.constant 0 : index
    %13 = vector.load %arg16[%c0_13, %c0_14] : memref<16x96xf32, #tpu.memory_space<vmem>>, vector<16x96xf32>
    tpu.vector_store %arg16[%c0_13, %c0_14], %12 {strides = array<i32>} : memref<16x96xf32, #tpu.memory_space<vmem>>, vector<16x96xf32>,
    %c0_15 = arith.constant 0 : index
    %c0_16 = arith.constant 0 : index
    %14 = vector.load %arg4[%c0_15, %c0_16] : memref<32x96xf32, #tpu.memory_space<vmem>>, vector<32x96xf32>
    %c0_17 = arith.constant 0 : index
    %c0_18 = arith.constant 0 : index
    %15 = vector.load %arg6[%c0_17, %c0_18] : memref<1x96xf32, #tpu.memory_space<vmem>>, vector<1x96xf32>
    %c0_19 = arith.constant 0 : index
    %c0_20 = arith.constant 0 : index
    %16 = vector.load %arg8[%c0_19, %c0_20] : memref<32x96xf32, #tpu.memory_space<vmem>>, vector<32x96xf32>
    %c0_21 = arith.constant 0 : index
    %c0_22 = arith.constant 0 : index
    %17 = vector.load %arg10[%c0_21, %c0_22] : memref<1x96xf32, #tpu.memory_space<vmem>>, vector<1x96xf32>
    %c0_23 = arith.constant 0 : index
    %c0_24 = arith.constant 0 : index
    %c0_25 = arith.constant 0 : index
    %18 = vector.load %arg1[%c0_23, %c0_24, %c0_25] : memref<2x2x32xf32, #tpu.memory_space<vmem>>, vector<1x2x32xf32>
    %19 = vector.shape_cast %18 : vector<1x2x32xf32> to vector<2x32xf32>
    %c0_i32_26 = arith.constant 0 : i32
    %c8_i32 = arith.constant 8 : i32
    %20 = arith.addi %c0_i32_26, %c8_i32 : i32
    %c1_i32_27 = arith.constant 1 : i32
    %21 = scf.for %arg17 = %c0_i32_26 to %20 step %c1_i32_27 iter_args(%arg18 = %19) -> (vector<2x32xf32>)  : i32 {
      %c2_i32 = arith.constant 2 : i32
      %32 = arith.muli %arg17, %c2_i32 : i32
      %33 = arith.index_cast %32 : i32 to index
      %c0_41 = arith.constant 0 : index
      %34 = vector.load %arg15[%33, %c0_41] : memref<16x96xf32, #tpu.memory_space<vmem>>, vector<2x96xf32>
      %cst_42 = arith.constant dense<0.000000e+00> : vector<2x96xf32>
      %35 = tpu.matmul %arg18, %14, %cst_42 {dimension_numbers = #tpu.dot_dimension_numbers<[1], [0], [0], [1], [0, 0, 1, 1], [], []>} : vector<2x32xf32>, vector<32x96xf32>, vector<2x96xf32> -> vector<2x96xf32>
      %36 = vector.broadcast %15 : vector<1x96xf32> to vector<2x96xf32>
      %37 = arith.addf %35, %36 : vector<2x96xf32>
      %38 = vector.extract_strided_slice %34 {offsets = [0, 0], sizes = [2, 32], strides = [1, 1]} : vector<2x96xf32> to vector<2x32xf32>
      %39 = vector.extract_strided_slice %37 {offsets = [0, 0], sizes = [2, 32], strides = [1, 1]} : vector<2x96xf32> to vector<2x32xf32>
      %40 = arith.addf %38, %39 : vector<2x32xf32>
      %41 = arith.negf %40 : vector<2x32xf32>
      %42 = math.exp %41 : vector<2x32xf32>
      %cst_43 = arith.constant 1.000000e+00 : f32
      %43 = vector.broadcast %cst_43 : f32 to vector<2x32xf32>
      %44 = arith.addf %43, %42 : vector<2x32xf32>
      %45 = arith.divf %43, %44 : vector<2x32xf32>
      %46 = vector.extract_strided_slice %34 {offsets = [0, 32], sizes = [2, 32], strides = [1, 1]} : vector<2x96xf32> to vector<2x32xf32>
      %47 = vector.extract_strided_slice %37 {offsets = [0, 32], sizes = [2, 32], strides = [1, 1]} : vector<2x96xf32> to vector<2x32xf32>
      %48 = arith.addf %46, %47 : vector<2x32xf32>
      %49 = arith.negf %48 : vector<2x32xf32>
      %50 = math.exp %49 : vector<2x32xf32>
      %cst_44 = arith.constant 1.000000e+00 : f32
      %51 = vector.broadcast %cst_44 : f32 to vector<2x32xf32>
      %52 = arith.addf %51, %50 : vector<2x32xf32>
      %53 = arith.divf %51, %52 : vector<2x32xf32>
      %54 = vector.extract_strided_slice %34 {offsets = [0, 64], sizes = [2, 32], strides = [1, 1]} : vector<2x96xf32> to vector<2x32xf32>
      %55 = vector.extract_strided_slice %37 {offsets = [0, 64], sizes = [2, 32], strides = [1, 1]} : vector<2x96xf32> to vector<2x32xf32>
      %56 = arith.mulf %45, %55 : vector<2x32xf32>
      %57 = arith.addf %54, %56 : vector<2x32xf32>
      %58 = math.tanh %57 : vector<2x32xf32>
      %cst_45 = arith.constant 1.000000e+00 : f32
      %59 = vector.broadcast %cst_45 : f32 to vector<2x32xf32>
      %60 = arith.subf %59, %53 : vector<2x32xf32>
      %61 = arith.mulf %60, %58 : vector<2x32xf32>
      %62 = arith.mulf %53, %arg18 : vector<2x32xf32>
      %63 = arith.addf %61, %62 : vector<2x32xf32>
      %64 = arith.index_cast %arg17 : i32 to index
      %c0_46 = arith.constant 0 : index
      %c0_47 = arith.constant 0 : index
      %65 = vector.load %arg11[%64, %c0_46, %c0_47] : memref<8x2x32xf32, #tpu.memory_space<vmem>>, vector<1x2x32xf32>
      %66 = vector.shape_cast %65 : vector<1x2x32xf32> to vector<2x32xf32>
      %67 = vector.shape_cast %63 : vector<2x32xf32> to vector<1x2x32xf32>
      tpu.vector_store %arg11[%64, %c0_46, %c0_47], %67 {strides = array<i32>} : memref<8x2x32xf32, #tpu.memory_space<vmem>>, vector<1x2x32xf32>,
      scf.yield %63 : vector<2x32xf32>
    }
    %c8_i32_28 = arith.constant 8 : i32
    %c1 = arith.constant 1 : index
    %c0_29 = arith.constant 0 : index
    %c0_30 = arith.constant 0 : index
    %22 = vector.load %arg1[%c1, %c0_29, %c0_30] : memref<2x2x32xf32, #tpu.memory_space<vmem>>, vector<1x2x32xf32>
    %23 = vector.shape_cast %22 : vector<1x2x32xf32> to vector<2x32xf32>
    %c0_i32_31 = arith.constant 0 : i32
    %c8_i32_32 = arith.constant 8 : i32
    %24 = arith.addi %c0_i32_31, %c8_i32_32 : i32
    %c1_i32_33 = arith.constant 1 : i32
    %25 = scf.for %arg17 = %c0_i32_31 to %24 step %c1_i32_33 iter_args(%arg18 = %23) -> (vector<2x32xf32>)  : i32 {
      %c7_i32 = arith.constant 7 : i32
      %32 = arith.subi %c7_i32, %arg17 : i32
      %c2_i32 = arith.constant 2 : i32
      %33 = arith.muli %32, %c2_i32 : i32
      %34 = arith.index_cast %33 : i32 to index
      %c0_41 = arith.constant 0 : index
      %35 = vector.load %arg16[%34, %c0_41] : memref<16x96xf32, #tpu.memory_space<vmem>>, vector<2x96xf32>
      %cst_42 = arith.constant dense<0.000000e+00> : vector<2x96xf32>
      %36 = tpu.matmul %arg18, %16, %cst_42 {dimension_numbers = #tpu.dot_dimension_numbers<[1], [0], [0], [1], [0, 0, 1, 1], [], []>} : vector<2x32xf32>, vector<32x96xf32>, vector<2x96xf32> -> vector<2x96xf32>
      %37 = vector.broadcast %17 : vector<1x96xf32> to vector<2x96xf32>
      %38 = arith.addf %36, %37 : vector<2x96xf32>
      %39 = vector.extract_strided_slice %35 {offsets = [0, 0], sizes = [2, 32], strides = [1, 1]} : vector<2x96xf32> to vector<2x32xf32>
      %40 = vector.extract_strided_slice %38 {offsets = [0, 0], sizes = [2, 32], strides = [1, 1]} : vector<2x96xf32> to vector<2x32xf32>
      %41 = arith.addf %39, %40 : vector<2x32xf32>
      %42 = arith.negf %41 : vector<2x32xf32>
      %43 = math.exp %42 : vector<2x32xf32>
      %cst_43 = arith.constant 1.000000e+00 : f32
      %44 = vector.broadcast %cst_43 : f32 to vector<2x32xf32>
      %45 = arith.addf %44, %43 : vector<2x32xf32>
      %46 = arith.divf %44, %45 : vector<2x32xf32>
      %47 = vector.extract_strided_slice %35 {offsets = [0, 32], sizes = [2, 32], strides = [1, 1]} : vector<2x96xf32> to vector<2x32xf32>
      %48 = vector.extract_strided_slice %38 {offsets = [0, 32], sizes = [2, 32], strides = [1, 1]} : vector<2x96xf32> to vector<2x32xf32>
      %49 = arith.addf %47, %48 : vector<2x32xf32>
      %50 = arith.negf %49 : vector<2x32xf32>
      %51 = math.exp %50 : vector<2x32xf32>
      %cst_44 = arith.constant 1.000000e+00 : f32
      %52 = vector.broadcast %cst_44 : f32 to vector<2x32xf32>
      %53 = arith.addf %52, %51 : vector<2x32xf32>
      %54 = arith.divf %52, %53 : vector<2x32xf32>
      %55 = vector.extract_strided_slice %35 {offsets = [0, 64], sizes = [2, 32], strides = [1, 1]} : vector<2x96xf32> to vector<2x32xf32>
      %56 = vector.extract_strided_slice %38 {offsets = [0, 64], sizes = [2, 32], strides = [1, 1]} : vector<2x96xf32> to vector<2x32xf32>
      %57 = arith.mulf %46, %56 : vector<2x32xf32>
      %58 = arith.addf %55, %57 : vector<2x32xf32>
      %59 = math.tanh %58 : vector<2x32xf32>
      %cst_45 = arith.constant 1.000000e+00 : f32
      %60 = vector.broadcast %cst_45 : f32 to vector<2x32xf32>
      %61 = arith.subf %60, %54 : vector<2x32xf32>
      %62 = arith.mulf %61, %59 : vector<2x32xf32>
      %63 = arith.mulf %54, %arg18 : vector<2x32xf32>
      %64 = arith.addf %62, %63 : vector<2x32xf32>
      %65 = arith.index_cast %32 : i32 to index
      %c0_46 = arith.constant 0 : index
      %c0_47 = arith.constant 0 : index
      %66 = vector.load %arg12[%65, %c0_46, %c0_47] : memref<8x2x32xf32, #tpu.memory_space<vmem>>, vector<1x2x32xf32>
      %67 = vector.shape_cast %66 : vector<1x2x32xf32> to vector<2x32xf32>
      %68 = vector.shape_cast %64 : vector<2x32xf32> to vector<1x2x32xf32>
      tpu.vector_store %arg12[%65, %c0_46, %c0_47], %68 {strides = array<i32>} : memref<8x2x32xf32, #tpu.memory_space<vmem>>, vector<1x2x32xf32>,
      scf.yield %64 : vector<2x32xf32>
    }
    %c8_i32_34 = arith.constant 8 : i32
    %c0_35 = arith.constant 0 : index
    %c0_36 = arith.constant 0 : index
    %c0_37 = arith.constant 0 : index
    %26 = vector.load %arg13[%c0_35, %c0_36, %c0_37] : memref<2x2x32xf32, #tpu.memory_space<vmem>>, vector<1x2x32xf32>
    %27 = vector.shape_cast %26 : vector<1x2x32xf32> to vector<2x32xf32>
    %28 = vector.shape_cast %21 : vector<2x32xf32> to vector<1x2x32xf32>
    tpu.vector_store %arg13[%c0_35, %c0_36, %c0_37], %28 {strides = array<i32>} : memref<2x2x32xf32, #tpu.memory_space<vmem>>, vector<1x2x32xf32>,
    %c1_38 = arith.constant 1 : index
    %c0_39 = arith.constant 0 : index
    %c0_40 = arith.constant 0 : index
    %29 = vector.load %arg13[%c1_38, %c0_39, %c0_40] : memref<2x2x32xf32, #tpu.memory_space<vmem>>, vector<1x2x32xf32>
    %30 = vector.shape_cast %29 : vector<1x2x32xf32> to vector<2x32xf32>
    %31 = vector.shape_cast %25 : vector<2x32xf32> to vector<1x2x32xf32>
    tpu.vector_store %arg13[%c1_38, %c0_39, %c0_40], %31 {strides = array<i32>} : memref<2x2x32xf32, #tpu.memory_space<vmem>>, vector<1x2x32xf32>,
    return
  }
}

</mosaic_0001>

<bundles_post_ra>
// kernel: encoder_forward.1
= control target key start
LH: loop header
LB: loop body
LE: loop exit
PB: predicated region body
PF: predicated region fallthrough
CT: control target
= control target key end

     0   :  { %19 = vsyncpa [#allocation8], 0  ;;  %s834_s0 = inlined_call_operand.vmem [shape: s32[16], index: 0, kind: input, shape index: {}]   ;;  %s835_s1 = inlined_call_operand.vmem [shape: f32[2,2,32], index: 1, kind: input, shape index: {}]   ;;  %s836_s2 = inlined_call_operand.vmem [shape: f32[50,32], index: 2, kind: input, shape index: {}]   ;;  %s837_s3 = inlined_call_operand.vmem [shape: f32[32,96], index: 3, kind: input, shape index: {}]   ;;  %s838_s4 = inlined_call_operand.vmem [shape: f32[32,96], index: 4, kind: input, shape index: {}]   ;;  %s839_s5 = inlined_call_operand.vmem [shape: f32[1,96], index: 5, kind: input, shape index: {}]   ;;  %s840_s6 = inlined_call_operand.vmem [shape: f32[1,96], index: 6, kind: input, shape index: {}]   ;;  %s841_s7 = inlined_call_operand.vmem [shape: f32[32,96], index: 7, kind: input, shape index: {}]   ;;  %s842_s8 = inlined_call_operand.hbm [shape: f32[32,96], index: 8, kind: input, shape index: {}]   ;;  %s843_s9 = inlined_call_operand.vmem [shape: f32[1,96], index: 9, kind: input, shape index: {}]   ;;  %s844_s10 = inlined_call_operand.vmem [shape: f32[1,96], index: 10, kind: input, shape index: {}]   ;;  %s845_s11 = inlined_call_operand.vmem [shape: f32[8,2,32], index: 11, kind: output, shape index: {0}]   ;;  %s846_s12 = inlined_call_operand.vmem [shape: f32[8,2,32], index: 12, kind: output, shape index: {1}]   ;;  %s847_s13 = inlined_call_operand.hbm [shape: f32[2,2,32], index: 13, kind: output, shape index: {2}]  }
   0x1   :  { %20 = vsyncpa [#allocation6], 0 }
   0x2   :  { %21 = vsyncpa [#allocation7], 0  ;;  %s27_s27 = sshll.u32 %s834_s0, 4  ;;  %s49_s30 = sshll.u32 %s842_s8, 4  ;;  %s28_s27 = int_to_ptr.vmem [resolvable:$true] %s27_s27  ;;  %s50_s30 = int_to_ptr.hbm [resolvable:$true] %s49_s30 }
   0x3   :  { %s598_s14 = smov [#allocation5]   ;;  %s599_s15 = smov [#allocation9]  }
   0x4   :  { %30 = dma.vmem_to_smem %s28_s27, 16, %s598_s14, [#allocation8]  }
   0x5   :  { %s51_s16 = sshll.u32 %s599_s15, 4  ;;  %s600_s17 = smov 128   ;;  %s52_s16 = int_to_ptr.vmem [resolvable:$true] %s51_s16 }
   0x6   :  { %s601_s18 = smov 8  }
   0x7   :  { %57 = dma.hbm_to_vmem [thread:$0]  %s50_s30, 512, %s52_s16, [#allocation6], %s600_s17, %s600_s17, %s601_s18  }
   0x8   :  { %572 = dma.done.wait [#allocation8], 16  }
   0x9   :  { %573 = vsyncadd [#allocation8], 4294967280 }
   0xa   :  { %574 = dma.done.wait [#allocation6], 512  }
   0xb   :  { %575 = vsyncadd [#allocation6], 4294966784 }
   0xc   :  { %70 = sfence }
   0xd   :  { %s578_s0 = smov 0  }
   0xe LB: > { %s77_s19 = sld [smem:[#allocation5 + %s580_s0]]  ;;  %vm81_vm0 = vcmask 253952   ;;  %s80_s22 = scalar_lea.vmem [#allocation2], %s580_s0  ;;  %s580_s0 = sphi %s578_s0, %s76_s0  }
   0xf   : > { %s76_s0 = sadd.s32 1, %s580_s0  }
  0x10   : > { %p73_p0 = scmp.ge.s32.totalorder %s76_s0, 16  }
  0x11   :  { %v88_v1 = vld [vmem:[%s837_s3 + $0x18] sm:$0xff] (%p73_p0)  ;;  %v87_v3 = vld [vmem:[%s837_s3 + $0x10] sm:$0xff] (%p73_p0)  ;;  %v86_v5 = vld [vmem:[%s837_s3 + $0x8] sm:$0xff] (%p73_p0)  ;;  %vm93_vm1 = vcmask (%p73_p0), 261120   ;;  %vm123_vm2 = vcmask (%p73_p0), 785408  }
  0x12   :  { %75 = sbr.rel (!%p73_p0) target bundleno = 14 (0xe), region = 117  ;;  %v129_v2 = vld [vmem:[%s841_s7 + $0x18] sm:$0xff] (%p73_p0)  ;;  %417 = vmatpush.msra.mxu2 (%p73_p0), %v88_v1  ;;  %v128_v4 = vld [vmem:[%s841_s7 + $0x10] sm:$0xff] (%p73_p0)  ;;  %v127_v6 = vld [vmem:[%s841_s7 + $0x8] sm:$0xff] (%p73_p0)  ;;  %112 = vmatpush.msra.mxu0 (%p73_p0), %v88_v1 }
  0x13   :  { %421 = vmatpush.msra.mxu3 (%p73_p0), %v129_v2  ;;  %146 = vmatpush.msra.mxu1 (%p73_p0), %v129_v2  ;;  %v85_v7 = vld [vmem:[%s837_s3] sm:$0xff] (%p73_p0)  ;;  %v726_v12 = vld [vmem:[%s838_s4 + $0x8] sm:$0xff] (%p73_p0)  ;;  %v731_v13 = vld [vmem:[%s838_s4 + $0x10] sm:$0xff] (%p73_p0) }
  0x14   : > { %s78_s21 = scalar_lea.vmem %s836_s2, %s77_s19  ;;  %418 = vmatpush.msra.mxu2 (%p73_p0), %v87_v3  ;;  %v126_v8 = vld [vmem:[%s841_s7] sm:$0xff] (%p73_p0)  ;;  %113 = vmatpush.msra.mxu0 (%p73_p0), %v87_v3  ;;  %v736_v14 = vld [vmem:[%s838_s4 + $0x18] sm:$0xff] (%p73_p0)  ;;  %v743_v16 = vld [vmem:[#allocation9] sm:$0xff] (%p73_p0) }
  0x15   : > { %v79_v0 = vld [vmem:[%s78_s21] sm:$0x1]  ;;  %422 = vmatpush.msra.mxu3 (%p73_p0), %v128_v4  ;;  %147 = vmatpush.msra.mxu1 (%p73_p0), %v128_v4  ;;  %v745_v17 = vld [vmem:[#allocation9 + $0x8] sm:$0xff] (%p73_p0)  ;;  %v749_v19 = vld [vmem:[#allocation9 + $0x18] sm:$0xff] (%p73_p0) }
  0x16   : > { %82 = vst.msk [vmem:[%s80_s22] sm:$0x1] %vm81_vm0, %v79_v0  ;;  %419 = vmatpush.msra.mxu2 (%p73_p0), %v86_v5  ;;  %114 = vmatpush.msra.mxu0 (%p73_p0), %v86_v5  ;;  %v721_v11 = vld [vmem:[%s838_s4] sm:$0xff] (%p73_p0) }
  0x17   :  { %423 = vmatpush.msra.mxu3 %v127_v6  ;;  %148 = vmatpush.msra.mxu1 %v127_v6  ;;  %v741_v15 = vld [vmem:[%s840_s6] sm:$0x1] }
  0x18   :  { %420 = vmatpush.msra.mxu2 %v85_v7  ;;  %115 = vmatpush.msra.mxu0 %v85_v7  ;;  %v747_v18 = vld [vmem:[#allocation9 + $0x10] sm:$0xff] }
  0x19   :  { %424 = vmatpush.msra.mxu3 %v126_v8  ;;  %149 = vmatpush.msra.mxu1 %v126_v8  ;;  %v754_v20 = vld [vmem:[%s844_s10] sm:$0x1] }
  0x1a   :  { %v169_v21 = vld [vmem:[%s835_s1] sm:$0x3]  }
  0x1b   :  { %v478_v22 = vld [vmem:[%s839_s5] ss:$0 sm:$0xff]  ;;  %s767_s5 = smov 0  }
  0x1c   :  { %v479_v23 = vld [vmem:[%s843_s9] ss:$0 sm:$0xff] }
  0x1d   :  { %v84_v9 = vld [vmem:[#allocation2 + $0x8] sm:$0xff]  ;;  %v83_v10 = vld [vmem:[#allocation2] sm:$0xff] }
  0x1e   :  { %407 = vmatmul.msk.f32.vlgmr.msra.gmra.mxu2 %vm93_vm1, %v84_v9  ;;  %409 = vmatmul.msk.f32.vlgmr.msra.gmra.mxu3 %vm93_vm1, %v84_v9 }
  0x1f   :  { %406 = vmatmul.msk.f32.vlgmr.msra.gmra.mxu0 %vm93_vm1, %v83_v10  ;;  %408 = vmatmul.msk.f32.vlgmr.msra.gmra.mxu1 %vm93_vm1, %v83_v10 }
  0x9c   :  { %v117_v24 = vpop.f32.mrf.mxu0  ;;  %v151_v25 = vpop.f32.mrf.mxu1 }
  0x9d   :  { %v118_v26 = vadd.f32 %v478_v22, %v117_v24  ;;  %v152_v27 = vadd.f32 %v479_v23, %v151_v25 }
  0x9f   :  { %124 = vst.msk [vmem:[#allocation3] sm:$0xff] %vm123_vm2, %v118_v26 }
  0xa0   :  { %157 = vst.msk [vmem:[#allocation4] sm:$0xff] %vm123_vm2, %v152_v27 }
  0xa1   :  { %v120_v28 = vpop.f32.mrf.mxu2  ;;  %v154_v29 = vpop.f32.mrf.mxu3 }
  0xa2   :  { %v121_v30 = vadd.f32 %v478_v22, %v120_v28  ;;  %v155_v31 = vadd.f32 %v479_v23, %v154_v29 }
  0xa4   :  { %125 = vst.msk [vmem:[#allocation3 + $0x8] sm:$0xff] %vm123_vm2, %v121_v30 }
  0xa5   :  { %158 = vst.msk [vmem:[#allocation4 + $0x8] sm:$0xff] %vm123_vm2, %v155_v31 }
  0xa6 LB: > { %198 = vmatpush.msra.mxu0 %v736_v14  ;;  %v181_v32 = vperm.slane %v741_v15, 0  ;;  %s602_s9 = smov 64   ;;  %s410_s10 = sshll.u32 %s588_s5, 1  ;;  %vm253_vm7 = vcmask 254976   ;;  %s588_s5 = sphi %s767_s5, %s175_s5   ;;  %v584_v21 = vphi %v169_v21, %v849_v21  }
  0xa7   : > { %s178_s2 = scalar_lea.vmem [#allocation3], %s410_s10  ;;  %s603_s16 = smov 96  }
  0xa8   : > { %199 = vmatpush.msra.mxu0 %v731_v13  ;;  %s604_s17 = smov 32   ;;  %s252_s19 = scalar_lea.vmem %s845_s11, %s410_s10 }
  0xa9   : > { %s175_s5 = sadd.s32 1, %s588_s5  }
  0xaa   : > { %200 = vmatpush.msra.mxu0 %v726_v12  ;;  %p172_p1 = scmp.ge.s32.totalorder %s175_s5, 8  }
  0xab   : > { %v179_v35 = vld [vmem:[%s178_s2] sm:$0x3]  ;;  %v413_v62 = vld [vmem:[%s835_s1 + $0x2] sm:$0x3] (%p172_p1)   ;;  %s802_s8 = smov (%p172_p1), 0  }
  0xac   : > { %201 = vmatpush.msra.mxu0 %v721_v11 }
  0xad   : > { %411 = vmatmul.msk.f32.vlgmr.msra.gmra.mxu0 %vm93_vm1, %v584_v21 }
 0x12a   : > { %v203_v33 = vpop.f32.mrf.mxu0 }
 0x12b   : > { %v204_v34 = vadd.f32 %v203_v33, %v181_v32 }
 0x12d   : > { %227 = vrot.lane.b32.xlu0 %v204_v34, %s602_s9  ;;  %v206_v36 = vadd.f32 %v204_v34, %v179_v35 }
 0x12f   : > { %v412_v37 = vmul.f32 -1.442695, %v206_v36 }
 0x131   : > { %480 = vpow2.f32 %v412_v37 }
 0x137   : > { %v481_v38 = vpop.eup %480 }
 0x138   : > { %v210_v39 = vadd.f32 1.0, %v481_v38 }
 0x13a   : > { %482 = vrcp.f32 %v210_v39  ;;  %v222_v45 = vand.u32 2147483648, %v210_v39  ;;  %vm216_vm4 = vweird.f32 %v210_v39  ;;  %v220_v46 = vand.u32 2147483647, %v210_v39 }
 0x13c   : > { %v223_v48 = vor.u32 1.1754944e-38, %v222_v45  ;;  %vm221_vm6 = vcmp.eq.f32.partialorder %v220_v46, 8.507059e+37 }
 0x140   : > { %v483_v40 = vpop.eup %482 }
 0x141   : > { %v212_v41 = vmul.f32 %v483_v40, %v210_v39  ;;  %vm217_vm3 = vweird.f32 %v483_v40 }
 0x142   : > { %vm218_vm5 = vmor %vm216_vm4, %vm217_vm3 }
 0x143   : > { %v213_v42 = vsub.f32 1.0, %v212_v41 }
 0x145   : > { %v214_v43 = vmul.f32 %v483_v40, %v213_v42 }
 0x147   : > { %v215_v44 = vadd.f32 %v483_v40, %v214_v43 }
 0x149   : > { %v219_v47 = vsel %vm218_vm5, %v483_v40, %v215_v44 }
 0x14a   : > { %v224_v50 = vsel %vm221_vm6, %v223_v48, %v219_v47 }
 0x14b   : > { %v237_v56 = vsub.f32 1.0, %v224_v50 }
 0x19f   : > { %v228_v49 = vpop.permute.xlu0 %227 }
 0x1a0   : > { %v230_v51 = vmul.f32 %v228_v49, %v224_v50 }
 0x1a2   : > { %232 = vrot.lane.b32.xlu0 %v230_v51, %s602_s9 }
 0x214   : > { %v233_v52 = vpop.permute.xlu0 %232 }
 0x215   : > { %v235_v53 = vadd.f32 %v233_v52, %v179_v35 }
 0x217   : > { %484 = vtanh.f32 %v235_v53 }
 0x21d   : > { %v485_v54 = vpop.eup %484 }
 0x21e   : > { %239 = vrot.lane.b32.xlu1 %v485_v54, %s603_s16 }
 0x226   : > { %243 = vrot.lane.b32.xlu1 %v584_v21, %s604_s17 }
 0x290   : > { %v240_v55 = vpop.permute.xlu1 %239 }
 0x291   : > { %v242_v58 = vmul.f32 %v240_v55, %v237_v56 }
 0x298   : > { %v244_v57 = vpop.permute.xlu1 %243 }
 0x299   : > { %v246_v59 = vmul.f32 %v244_v57, %v224_v50 }
 0x29b   : > { %v247_v60 = vadd.f32 %v246_v59, %v242_v58 }
 0x29d   : > { %249 = vrot.lane.b32.xlu2 %v247_v60, %s603_s16 }
 0x2f5   :  { %174 = sbr.rel (!%p172_p1) target bundleno = 166 (0xa6), region = 128 }
 0x2f7   : > { %v787_v21 = vpop.permute.xlu2 %249  }
 0x2f8   : > { %v848_v61 = vmov %v787_v21 }
 0x2f9   : > { %254 = vst.msk [vmem:[%s252_s19] sm:$0x3] %vm253_vm7, %v848_v61  ;;  %v849_v21 = vmov %v848_v61 }
 0x2fa LB: > { %286 = vmatpush.msra.mxu0 %v749_v19  ;;  %v269_v63 = vperm.slane %v754_v20, 0  ;;  %s605_s1 = smov 64   ;;  %s264_s11 = ssub.s32 7, %s596_s8  ;;  %s596_s8 = sphi %s802_s8, %s262_s8   ;;  %v592_v62 = vphi %v413_v62, %v850_v62  }
 0x2fb   : > { %s815_s20 = sshll.u32 %s264_s11, 1  ;;  %s606_s22 = smov 96  }
 0x2fc   : > { %287 = vmatpush.msra.mxu0 %v747_v18  ;;  %s266_s21 = scalar_lea.vmem [#allocation4], %s815_s20  ;;  %s607_s23 = smov 32  }
 0x2fd   : > { %v267_v2 = vld [vmem:[%s266_s21] sm:$0x3]  ;;  %s340_s26 = scalar_lea.vmem %s846_s12, %s815_s20  ;;  %s262_s8 = sadd.s32 1, %s596_s8  }
 0x2fe   : > { %288 = vmatpush.msra.mxu0 %v745_v17  ;;  %p259_p2 = scmp.ge.s32.totalorder %s262_s8, 8  }
 0x2ff   :  { %344 = vst.msk [vmem:[#allocation10] sm:$0x3] (%p259_p2), %vm253_vm7, %v848_v61  ;;  %s357_s4 = sshll.u32 (%p259_p2), %s847_s13, 4  ;;  %s608_s29 = smov (%p259_p2), [#allocation10]   ;;  %s358_s4 = int_to_ptr.hbm [resolvable:$true] %s357_s4 }
 0x300   : > { %289 = vmatpush.msra.mxu0 %v743_v16  ;;  %s355_s30 = sshll.u32 (%p259_p2), %s608_s29, 4  ;;  %s609_s6 = smov (%p259_p2), 32   ;;  %s356_s30 = int_to_ptr.vmem [resolvable:$true] %s355_s30 }
 0x301   : > { %415 = vmatmul.msk.f32.vlgmr.msra.gmra.mxu0 %vm93_vm1, %v592_v62  ;;  %s610_s14 = smov (%p259_p2), 2  }
 0x37e   : > { %v291_v0 = vpop.f32.mrf.mxu0 }
 0x37f   : > { %v292_v1 = vadd.f32 %v291_v0, %v269_v63 }
 0x381   : > { %315 = vrot.lane.b32.xlu0 %v292_v1, %s605_s1  ;;  %v294_v3 = vadd.f32 %v292_v1, %v267_v2 }
 0x383   : > { %v416_v4 = vmul.f32 -1.442695, %v294_v3 }
 0x385   : > { %486 = vpow2.f32 %v416_v4 }
 0x38b   : > { %v487_v5 = vpop.eup %486 }
 0x38c   : > { %v298_v6 = vadd.f32 1.0, %v487_v5 }
 0x38e   : > { %488 = vrcp.f32 %v298_v6  ;;  %v310_v12 = vand.u32 2147483648, %v298_v6  ;;  %vm304_vm9 = vweird.f32 %v298_v6  ;;  %v308_v13 = vand.u32 2147483647, %v298_v6 }
 0x390   : > { %v311_v15 = vor.u32 1.1754944e-38, %v310_v12  ;;  %vm309_vm11 = vcmp.eq.f32.partialorder %v308_v13, 8.507059e+37 }
 0x394   : > { %v489_v7 = vpop.eup %488 }
 0x395   : > { %v300_v8 = vmul.f32 %v489_v7, %v298_v6  ;;  %vm305_vm8 = vweird.f32 %v489_v7 }
 0x396   : > { %vm306_vm10 = vmor %vm304_vm9, %vm305_vm8 }
 0x397   : > { %v301_v9 = vsub.f32 1.0, %v300_v8 }
 0x399   : > { %v302_v10 = vmul.f32 %v489_v7, %v301_v9 }
 0x39b   : > { %v303_v11 = vadd.f32 %v489_v7, %v302_v10 }
 0x39d   : > { %v307_v14 = vsel %vm306_vm10, %v489_v7, %v303_v11 }
 0x39e   : > { %v312_v22 = vsel %vm309_vm11, %v311_v15, %v307_v14 }
 0x39f   : > { %v325_v28 = vsub.f32 1.0, %v312_v22 }
 0x3f3   : > { %v316_v21 = vpop.permute.xlu0 %315 }
 0x3f4   : > { %v318_v23 = vmul.f32 %v316_v21, %v312_v22 }
 0x3f6   : > { %320 = vrot.lane.b32.xlu0 %v318_v23, %s605_s1 }
 0x468   : > { %v321_v24 = vpop.permute.xlu0 %320 }
 0x469   : > { %v323_v25 = vadd.f32 %v321_v24, %v267_v2 }
 0x46b   : > { %490 = vtanh.f32 %v323_v25 }
 0x471   : > { %v491_v26 = vpop.eup %490 }
 0x472   : > { %327 = vrot.lane.b32.xlu1 %v491_v26, %s606_s22 }
 0x47a   : > { %331 = vrot.lane.b32.xlu1 %v592_v62, %s607_s23 }
 0x4e4   : > { %v328_v27 = vpop.permute.xlu1 %327 }
 0x4e5   : > { %v330_v30 = vmul.f32 %v328_v27, %v325_v28 }
 0x4ec   : > { %v332_v29 = vpop.permute.xlu1 %331 }
 0x4ed   : > { %v334_v31 = vmul.f32 %v332_v29, %v312_v22 }
 0x4ef   : > { %v335_v32 = vadd.f32 %v334_v31, %v330_v30 }
 0x4f1   : > { %337 = vrot.lane.b32.xlu2 %v335_v32, %s606_s22 }
 0x548   :  { %261 = sbr.rel (!%p259_p2) target bundleno = 762 (0x2fa), region = 139 }
 0x54b   : > { %v338_v33 = vpop.permute.xlu2 %337  }
 0x54c   : > { %342 = vst.msk [vmem:[%s340_s26] sm:$0x3] %vm253_vm7, %v338_v33  ;;  %v850_v62 = vmov %v338_v33 }
 0x54d   :  { %346 = vst.msk [vmem:[#allocation10 + $0x2] sm:$0x3] %vm253_vm7, %v338_v33 }
 0x54e   :  { %363 = dma.vmem_to_hbm [thread:$0]  %s356_s30, 64, %s358_s4, [#allocation7], %s609_s6, %s609_s6, %s610_s14  }
 0x54f   :  { %576 = dma.done.wait [#allocation7], 64  }
 0x550   :  { %577 = vsyncadd [#allocation7], 4294967232 }
 0x551   :  { %372 = vsyncpa [#allocation6], 1 }
 0x552   :  { %373 = vsyncpa [#allocation7], 1 }
 0x553   :  { %374 = vsyncpa [#allocation8], 1 }

</bundles_post_ra>
